<compile_context>
chip_gen: v5e
topology: v5e:2x2
jax: 0.10.0
libtpu: 0.0.40
codegen_flags: <defaults>
</compile_context>

<pallas_src>
import functools

import jax
import jax.numpy as jnp
from jax.experimental import pallas as pl
from jax.experimental.pallas import tpu as pltpu


def _round_up(n: int, m: int) -> int:
    return -(-n // m) * m


def _vmem_capacity_bytes() -> int:
    try:
        return int(pltpu.get_tpu_info().vmem_capacity_bytes)
    except Exception:
        return 64 << 20  # conservative (v7x-sized) fallback


def _pick_batch_tiling(B: int, block_b: int):
    """Pick (TB, Bp, n_tiles): 128-row-aligned tiles for large B, >=2 tiles so
    both v7x TensorCores get work, padding bounded by one tile (and usually by
    one 128-row unit) instead of nearly doubling the batch."""
    if B <= 256:
        tb = _round_up(B, 8)          # small batch: single sublane-aligned tile
        return tb, tb, 1
    units = -(-B // 128)              # 128-row units after padding
    max_units = max(1, block_b // 128)
    want_tiles = max(-(-units // max_units), 2)        # >=2 keeps 2 TCs busy
    tb_units = min(max(units // want_tiles, 1), max_units)
    tb = tb_units * 128
    n_tiles = -(-units // tb_units)
    bp = n_tiles * tb
    return tb, bp, n_tiles


def _generator_kernel(x_ref, w1_ref, b1_ref, w2_ref, b2_ref, o_ref):
    # x tile arrives as f32 (single HBM trip); cast to bf16 on-chip for the MXU.
    x = x_ref[...].astype(jnp.bfloat16)
    # Layer 1: Linear (MXU, bf16 in / f32 acc) + bias + ReLU in f32.
    h = jnp.dot(x, w1_ref[...], preferred_element_type=jnp.float32) + b1_ref[...]
    h = jnp.maximum(h, 0.0)
    # Layer 2: Linear (activations back to bf16 for the MXU) + bias + tanh (EUP).
    y = (jnp.dot(h.astype(jnp.bfloat16), w2_ref[...],
                 preferred_element_type=jnp.float32) + b2_ref[...])
    o_ref[...] = jnp.tanh(y).astype(o_ref.dtype)


def prepare_generator_params(w1, b1, w2, b2):
    """One-time parameter prep (outside the per-call path): cast weights to
    bf16 and pad hidden/output dims to multiples of 128 (lane-dense).  Zero
    padding is exact: padded K rows contribute 0 and padded output columns are
    sliced off by the caller.  Accepts biases shaped (dim,) or (1, dim)."""
    w1 = jnp.asarray(w1)
    w2 = jnp.asarray(w2)
    b1 = jnp.asarray(b1).reshape(1, -1)
    b2 = jnp.asarray(b2).reshape(1, -1)
    in_dim, hid_dim = w1.shape
    out_dim = w2.shape[1]
    hid_p = _round_up(hid_dim, 128)
    out_p = _round_up(out_dim, 128)
    w1p = jnp.zeros((in_dim, hid_p), jnp.bfloat16).at[:, :hid_dim].set(
        w1.astype(jnp.bfloat16))
    b1p = jnp.zeros((1, hid_p), jnp.float32).at[:, :hid_dim].set(b1.astype(jnp.float32))
    w2p = jnp.zeros((hid_p, out_p), jnp.bfloat16).at[:hid_dim, :out_dim].set(
        w2.astype(jnp.bfloat16))
    b2p = jnp.zeros((1, out_p), jnp.float32).at[:, :out_dim].set(b2.astype(jnp.float32))
    return (w1p, b1p, w2p, b2p), out_dim


def generator_forward(x, w1p, b1p, w2p, b2p, *, out_dim, block_b=None):
    """Fused MLP generator forward: tanh(relu(x@W1+b1)@W2+b2), bf16 output."""
    B, in_dim = x.shape
    assert w1p.shape[0] == in_dim, (w1p.shape, in_dim)
    hid_p = w1p.shape[1]
    out_p = w2p.shape[1]

    vmem_phys = _vmem_capacity_bytes()
    if block_b is None:
        # 128 MiB parts (v5e/v6e) can afford bigger batch tiles than v7x (64 MiB).
        block_b = 1024 if vmem_phys >= (96 << 20) else 512

    TB, Bp, n_tiles = _pick_batch_tiling(B, block_b)

    # Batch-pad only; x stays f32 (bf16 cast happens inside the kernel).
    xp = x if Bp == B else jnp.zeros((Bp, in_dim), x.dtype).at[:B, :].set(x)

    # TODO(synk): for very large hidden dims where single-buffered bf16 weights
    #             exceed ~40 MiB, add a hidden-dim grid axis (tile W1 cols /
    #             W2 rows) with a VMEM accumulator + pl.when init/finalize;
    #             resident weights are fine for typical generator sizes.
    # TODO(synk): optional fp8(e4m3)+per-tensor-scale weight path for v7x MXU.

    itemsize = jnp.dtype(x.dtype).itemsize
    x_tile = TB * in_dim * itemsize                      # f32 input tile
    out_tile = TB * out_p * 2                            # bf16 output tile
    weights = (in_dim * hid_p + hid_p * out_p) * 2 + (hid_p + out_p) * 4  # 1-buffered
    interm = TB * (hid_p + out_p) * 4 + TB * max(in_dim, hid_p) * 2       # f32/bf16 temps
    need = 2 * (x_tile + out_tile) + weights + interm    # x/out double-buffered
    vmem_bytes = int(min(int(vmem_phys * 0.8), max(16 << 20, int(1.5 * need))))

    cost = pl.CostEstimate(
        flops=2 * Bp * (in_dim * hid_p + hid_p * out_p),
        transcendentals=Bp * out_p,
        bytes_accessed=(Bp * in_dim * itemsize + weights + Bp * out_p * 2),
    )

    resident = dict(pipeline_mode=pl.Buffered(1))  # constant blocks: 1 buffer, no re-DMA

    out_padded = pl.pallas_call(
        _generator_kernel,
        out_shape=jax.ShapeDtypeStruct((Bp, out_p), jnp.bfloat16),
        grid=(n_tiles,),
        in_specs=[
            pl.BlockSpec((TB, in_dim), lambda i: (i, 0)),                  # x: pipelined
            pl.BlockSpec((in_dim, hid_p), lambda i: (0, 0), **resident),   # W1 resident
            pl.BlockSpec((1, hid_p), lambda i: (0, 0), **resident),        # b1 resident
            pl.BlockSpec((hid_p, out_p), lambda i: (0, 0), **resident),    # W2 resident
            pl.BlockSpec((1, out_p), lambda i: (0, 0), **resident),        # b2 resident
        ],
        out_specs=pl.BlockSpec((TB, out_p), lambda i: (i, 0)),
        compiler_params=pltpu.CompilerParams(
            dimension_semantics=("parallel",),
            vmem_limit_bytes=vmem_bytes,
        ),
        cost_estimate=cost,
    )(xp, w1p, b1p, w2p, b2p)

    return out_padded[:B, :out_dim]


if __name__ == "__main__":
    # Small shapes consistent with the module's constructor args.
    batch = 8
    input_dim = 32
    hidden_dim = 64
    output_dim = 16

    key = jax.random.PRNGKey(0)
    k_x, k_w1, k_b1, k_w2, k_b2, k_x2 = jax.random.split(key, 6)

    x = jax.random.normal(k_x, (batch, input_dim), dtype=jnp.float32)
    # Deterministic in-script parameter init (scaled like PyTorch Linear default-ish).
    w1 = jax.random.normal(k_w1, (input_dim, hidden_dim), jnp.float32) / jnp.sqrt(input_dim)
    b1 = jax.random.normal(k_b1, (hidden_dim,), jnp.float32) * 0.01
    w2 = jax.random.normal(k_w2, (hidden_dim, output_dim), jnp.float32) / jnp.sqrt(hidden_dim)
    b2 = jax.random.normal(k_b2, (output_dim,), jnp.float32) * 0.01

    # One-time parameter padding/cast (outside the per-call jit path).
    (w1p, b1p, w2p, b2p), out_dim = prepare_generator_params(w1, b1, w2, b2)
    fwd = jax.jit(functools.partial(generator_forward, out_dim=out_dim))

    out = jax.block_until_ready(fwd(x, w1p, b1p, w2p, b2p))
    assert out.shape == (batch, output_dim), out.shape
    assert out.dtype == jnp.bfloat16, out.dtype

    def ref_f32(xi):
        return jnp.tanh(jnp.maximum(xi @ w1 + b1, 0.0) @ w2 + b2)

    def ref_bf16(xi):
        h = jnp.maximum(
            jnp.dot(xi.astype(jnp.bfloat16), w1.astype(jnp.bfloat16),
                    preferred_element_type=jnp.float32) + b1, 0.0)
        y = jnp.dot(h.astype(jnp.bfloat16), w2.astype(jnp.bfloat16),
                    preferred_element_type=jnp.float32) + b2
        return jnp.tanh(y)

    o32 = out.astype(jnp.float32)
    assert jnp.allclose(o32, ref_bf16(x), atol=2e-2, rtol=2e-2), "mismatch vs bf16 reference"
    assert jnp.allclose(o32, ref_f32(x), atol=5e-2, rtol=5e-2), "mismatch vs f32 reference"

    # Multi-tile / batch-padded path (exercises the grid + parallel semantics).
    x_big = jax.random.normal(k_x2, (300, input_dim), dtype=jnp.float32)
    out_big = jax.block_until_ready(fwd(x_big, w1p, b1p, w2p, b2p))
    assert out_big.shape == (300, output_dim), out_big.shape
    assert jnp.allclose(out_big.astype(jnp.float32), ref_f32(x_big),
                        atol=5e-2, rtol=5e-2), "mismatch vs f32 reference (big batch)"

    print("KERNEL_OK")
</pallas_src>

<mosaic_0001>
module attributes {stable_mosaic.version = 11 : i64} {
  func.func @_generator_kernel(%arg0: i32, %arg1: memref<8x32xf32, #tpu.memory_space<vmem>>, %arg2: memref<32x128xbf16, #tpu.memory_space<vmem>>, %arg3: memref<1x128xf32, #tpu.memory_space<vmem>>, %arg4: memref<128x128xbf16, #tpu.memory_space<vmem>>, %arg5: memref<1x128xf32, #tpu.memory_space<vmem>>, %arg6: memref<8x128xbf16, #tpu.memory_space<vmem>>) attributes {dimension_semantics = [#tpu.dimension_semantics<parallel>], iteration_bounds = array<i64: 1>, scalar_prefetch = 0 : i64, scratch_operands = 0 : i64, tpu.core_type = #tpu.core_type<tc>, window_params = [{transform_indices = @transform_0, window_bounds = array<i64: 8, 32>}, {pipeline_mode = #tpu.pipeline_mode<synchronous>, transform_indices = @transform_1, window_bounds = array<i64: 32, 128>}, {pipeline_mode = #tpu.pipeline_mode<synchronous>, transform_indices = @transform_2, window_bounds = array<i64: 1, 128>}, {pipeline_mode = #tpu.pipeline_mode<synchronous>, transform_indices = @transform_3, window_bounds = array<i64: 128, 128>}, {pipeline_mode = #tpu.pipeline_mode<synchronous>, transform_indices = @transform_4, window_bounds = array<i64: 1, 128>}, {transform_indices = @transform_5, window_bounds = array<i64: 8, 128>}]} {
    %c0 = arith.constant 0 : index
    %c0_0 = arith.constant 0 : index
    %0 = vector.load %arg1[%c0, %c0_0] : memref<8x32xf32, #tpu.memory_space<vmem>>, vector<8x32xf32>
    %1 = arith.truncf %0 : vector<8x32xf32> to vector<8x32xbf16>
    %c0_1 = arith.constant 0 : index
    %c0_2 = arith.constant 0 : index
    %2 = vector.load %arg2[%c0_1, %c0_2] : memref<32x128xbf16, #tpu.memory_space<vmem>>, vector<32x128xbf16>
    %cst = arith.constant dense<0.000000e+00> : vector<8x128xf32>
    %3 = tpu.matmul %1, %2, %cst {dimension_numbers = #tpu.dot_dimension_numbers<[1], [0], [0], [1], [0, 0, 1, 1], [], []>} : vector<8x32xbf16>, vector<32x128xbf16>, vector<8x128xf32> -> vector<8x128xf32>
    %c0_3 = arith.constant 0 : index
    %c0_4 = arith.constant 0 : index
    %4 = vector.load %arg3[%c0_3, %c0_4] : memref<1x128xf32, #tpu.memory_space<vmem>>, vector<1x128xf32>
    %5 = vector.broadcast %4 : vector<1x128xf32> to vector<8x128xf32>
    %6 = arith.addf %3, %5 : vector<8x128xf32>
    %cst_5 = arith.constant 0.000000e+00 : f32
    %7 = vector.broadcast %cst_5 : f32 to vector<8x128xf32>
    %8 = arith.maximumf %6, %7 : vector<8x128xf32>
    %9 = arith.truncf %8 : vector<8x128xf32> to vector<8x128xbf16>
    %c0_6 = arith.constant 0 : index
    %c0_7 = arith.constant 0 : index
    %10 = vector.load %arg4[%c0_6, %c0_7] : memref<128x128xbf16, #tpu.memory_space<vmem>>, vector<128x128xbf16>
    %cst_8 = arith.constant dense<0.000000e+00> : vector<8x128xf32>
    %11 = tpu.matmul %9, %10, %cst_8 {dimension_numbers = #tpu.dot_dimension_numbers<[1], [0], [0], [1], [0, 0, 1, 1], [], []>} : vector<8x128xbf16>, vector<128x128xbf16>, vector<8x128xf32> -> vector<8x128xf32>
    %c0_9 = arith.constant 0 : index
    %c0_10 = arith.constant 0 : index
    %12 = vector.load %arg5[%c0_9, %c0_10] : memref<1x128xf32, #tpu.memory_space<vmem>>, vector<1x128xf32>
    %13 = vector.broadcast %12 : vector<1x128xf32> to vector<8x128xf32>
    %14 = arith.addf %11, %13 : vector<8x128xf32>
    %15 = math.tanh %14 : vector<8x128xf32>
    %16 = arith.truncf %15 : vector<8x128xf32> to vector<8x128xbf16>
    %c0_11 = arith.constant 0 : index
    %c0_12 = arith.constant 0 : index
    %17 = vector.load %arg6[%c0_11, %c0_12] : memref<8x128xbf16, #tpu.memory_space<vmem>>, vector<8x128xbf16>
    tpu.vector_store %arg6[%c0_11, %c0_12], %16 {strides = array<i32>} : memref<8x128xbf16, #tpu.memory_space<vmem>>, vector<8x128xbf16>,
    return
  }
  func.func @transform_0(%arg0: i32) -> (i32, i32) {
    %c0_i32 = arith.constant 0 : i32
    %c0_i32_0 = arith.constant 0 : i32
    return %arg0, %c0_i32 : i32, i32
  }
  func.func @transform_1(%arg0: i32) -> (i32, i32) {
    %c0_i32 = arith.constant 0 : i32
    %c0_i32_0 = arith.constant 0 : i32
    %c0_i32_1 = arith.constant 0 : i32
    return %c0_i32, %c0_i32_0 : i32, i32
  }
  func.func @transform_2(%arg0: i32) -> (i32, i32) {
    %c0_i32 = arith.constant 0 : i32
    %c0_i32_0 = arith.constant 0 : i32
    %c0_i32_1 = arith.constant 0 : i32
    return %c0_i32, %c0_i32_0 : i32, i32
  }
  func.func @transform_3(%arg0: i32) -> (i32, i32) {
    %c0_i32 = arith.constant 0 : i32
    %c0_i32_0 = arith.constant 0 : i32
    %c0_i32_1 = arith.constant 0 : i32
    return %c0_i32, %c0_i32_0 : i32, i32
  }
  func.func @transform_4(%arg0: i32) -> (i32, i32) {
    %c0_i32 = arith.constant 0 : i32
    %c0_i32_0 = arith.constant 0 : i32
    %c0_i32_1 = arith.constant 0 : i32
    return %c0_i32, %c0_i32_0 : i32, i32
  }
  func.func @transform_5(%arg0: i32) -> (i32, i32) {
    %c0_i32 = arith.constant 0 : i32
    %c0_i32_0 = arith.constant 0 : i32
    return %arg0, %c0_i32 : i32, i32
  }
}

</mosaic_0001>

<bundles_post_ra>
// kernel: generator_forward.1
= control target key start
LH: loop header
LB: loop body
LE: loop exit
PB: predicated region body
PF: predicated region fallthrough
CT: control target
= control target key end

     0   :  { %10 = vsyncpa [#allocation3], 0  ;;  %s427_s0 = inlined_call_operand.hbm [shape: f32[8,32], index: 0, kind: input, shape index: {}]   ;;  %s428_s1 = inlined_call_operand.hbm [shape: bf16[32,128], index: 1, kind: input, shape index: {}]   ;;  %s429_s2 = inlined_call_operand.vmem [shape: f32[1,128], index: 2, kind: input, shape index: {}]   ;;  %s430_s3 = inlined_call_operand.hbm [shape: bf16[128,128], index: 3, kind: input, shape index: {}]   ;;  %s431_s4 = inlined_call_operand.vmem [shape: f32[1,128], index: 4, kind: input, shape index: {}]   ;;  %s432_s5 = inlined_call_operand.hbm [shape: bf16[8,128], index: 5, kind: output, shape index: {}]  }
   0x1   :  { %11 = vsyncpa [#allocation6], 0  ;;  %s28_s20 = sshll.u32 %s428_s1, 4  ;;  %s29_s20 = int_to_ptr.hbm [resolvable:$true] %s28_s20 }
   0x2   :  { %12 = vsyncpa [#allocation4], 0  ;;  %s373_s21 = smov [#allocation5]   ;;  %s18_s25 = sshll.u32 %s427_s0, 4  ;;  %s19_s25 = int_to_ptr.hbm [resolvable:$true] %s18_s25 }
   0x3   :  { %s30_s22 = sshll.u32 %s373_s21, 4  ;;  %s374_s26 = smov 64   ;;  %s31_s22 = int_to_ptr.vmem [resolvable:$true] %s30_s22 }
   0x4   :  { %s375_s27 = smov 4   ;;  %s376_s28 = smov [#allocation2]  }
   0x5   :  { %36 = dma.hbm_to_vmem [thread:$0]  %s29_s20, 256, %s31_s22, [#allocation6], %s374_s26, %s374_s26, %s375_s27  }
   0x6   :  { %s20_s29 = sshll.u32 %s376_s28, 4  ;;  %s43_s7 = sshll.u32 %s430_s3, 4  ;;  %s21_s29 = int_to_ptr.vmem [resolvable:$true] %s20_s29  ;;  %s44_s7 = int_to_ptr.hbm [resolvable:$true] %s43_s7 }
   0x7   :  { %23 = dma.hbm_to_vmem [thread:$0]  %s19_s25, 128, %s21_s29, [#allocation3]  }
   0x8   :  { %s377_s1 = smov [#allocation7]  }
   0x9   :  { %s45_s8 = sshll.u32 %s377_s1, 4  ;;  %s46_s8 = int_to_ptr.vmem [resolvable:$true] %s45_s8 }
   0xa   :  { %51 = dma.hbm_to_vmem [thread:$0]  %s44_s7, 1024, %s46_s8, [#allocation6], %s374_s26, %s374_s26, %s375_s27  }
   0xb   :  { %367 = dma.done.wait [#allocation3], 128  }
   0xc   :  { %368 = vsyncadd [#allocation3], 4294967168 }
   0xd   :  { %369 = dma.done.wait [#allocation6], 1280  }
   0xe   :  { %370 = vsyncadd [#allocation6], 4294966016  ;;  %v252_v0 = vld [vmem:[#allocation5 + $0x8] sm:$0xff]  ;;  %v251_v2 = vld [vmem:[#allocation5] sm:$0xff]  ;;  %vm89_vm0 = vcmask 261120   ;;  %s378_s11 = smov [#allocation8]  }
   0xf   :  { %v260_v1 = vld [vmem:[#allocation7 + $0x38] sm:$0xff]  ;;  %99 = vmatpush.bf16.msra.mxu0 %v252_v0  ;;  %v67_v3 = vld [vmem:[#allocation2] sm:$0xff]  ;;  %v259_v4 = vld [vmem:[#allocation7 + $0x30] sm:$0xff]  ;;  %s197_s12 = sshll.u32 %s378_s11, 4  ;;  %s199_s15 = sshll.u32 %s432_s5, 4  ;;  %s198_s12 = int_to_ptr.vmem [resolvable:$true] %s197_s12  ;;  %s200_s15 = int_to_ptr.hbm [resolvable:$true] %s199_s15 }
  0x10   :  { %176 = vmatpush.bf16.msra.mxu1 %v260_v1  ;;  %v68_v5 = vpack.c.bf16 %v67_v3, %v67_v3  ;;  %v258_v6 = vld [vmem:[#allocation7 + $0x28] sm:$0xff]  ;;  %v257_v7 = vld [vmem:[#allocation7 + $0x20] sm:$0xff]  ;;  %v256_v8 = vld [vmem:[#allocation7 + $0x18] sm:$0xff] }
  0x11   :  { %v255_v9 = vld [vmem:[#allocation7 + $0x10] sm:$0xff]  ;;  %v254_v10 = vld [vmem:[#allocation7 + $0x8] sm:$0xff]  ;;  %v253_v11 = vld [vmem:[#allocation7] sm:$0xff] }
  0x12   :  { %v267_v12 = vld [vmem:[%s429_s2] ss:$0 sm:$0xff] }
  0x13   :  { %100 = vmatpush.bf16.msra.mxu0 %v251_v2  ;;  %v268_v18 = vld [vmem:[%s431_s4] ss:$0 sm:$0xff] }
  0x14   :  { %177 = vmatpush.bf16.msra.mxu1 %v259_v4 }
  0x16   :  { %218 = vmatmul.msk.bf16.vlgmr.msra.gmra.mxu0 %vm89_vm0, %v68_v5 }
  0x18   :  { %178 = vmatpush.bf16.msra.mxu1 %v258_v6 }
  0x1c   :  { %179 = vmatpush.bf16.msra.mxu1 %v257_v7 }
  0x20   :  { %180 = vmatpush.bf16.msra.mxu1 %v256_v8 }
  0x24   :  { %181 = vmatpush.bf16.msra.mxu1 %v255_v9 }
  0x28   :  { %182 = vmatpush.bf16.msra.mxu1 %v254_v10 }
  0x2c   :  { %183 = vmatpush.bf16.msra.mxu1 %v253_v11 }
  0x93   :  { %v102_v13 = vpop.f32.mrf.mxu0 }
  0x94   :  { %v103_v14 = vadd.f32 %v267_v12, %v102_v13 }
  0x96   :  { %v106_v15 = vmax.f32 %v103_v14, 0.0 }
  0x98   :  { %v107_v16 = vpack.c.bf16 %v106_v15, %v106_v15 }
  0x9a   :  { %184 = vmatmul.bf16.vlgmr.msra.gmra.mxu1 %v107_v16 }
  0x9b   :  { %v104_v17 = vpop.f32.mrf.mxu0 }
 0x117   :  { %v185_v19 = vpop.f32.mrf.mxu1 }
 0x118   :  { %v186_v20 = vadd.f32 %v268_v18, %v185_v19 }
 0x11a   :  { %269 = vtanh.f32 %v186_v20 }
 0x11f   :  { %v187_v21 = vpop.f32.mrf.mxu1 }
 0x120   :  { %v270_v22 = vpop.eup %269 }
 0x121   :  { %v190_v23 = vpack.c.bf16 %v270_v22, %v270_v22 }
 0x123   :  { %191 = vst [vmem:[#allocation8] sm:$0xf] %v190_v23 }
 0x124   :  { %202 = dma.vmem_to_hbm [thread:$0]  %s198_s12, 64, %s200_s15, [#allocation4]  }
 0x125   :  { %371 = dma.done.wait [#allocation4], 64  }
 0x126   :  { %372 = vsyncadd [#allocation4], 4294967232 }
 0x127   :  { %207 = vsyncpa [#allocation3], 1 }
 0x128   :  { %208 = vsyncpa [#allocation6], 1 }
 0x129   :  { %209 = vsyncpa [#allocation4], 1 }

</bundles_post_ra>
